<compile_context>
chip_gen: v5e
topology: v5e:2x2
jax: 0.10.0
libtpu: 0.0.40
codegen_flags: <defaults>
</compile_context>

<pallas_src>
import functools
import math

import jax
import jax.numpy as jnp
from jax import lax
from jax.experimental import pallas as pl
from jax.experimental.pallas import tpu as pltpu


def _pick_tile(dim, preferred, quantum=16):
    """Largest tile <= preferred that divides dim and is a multiple of `quantum`.

    Tries quantum first, then 8, then falls back to the full dimension (a block
    equal to the full array dim is always legal for a BlockSpec).
    """
    if dim <= preferred:
        return dim
    for q in (quantum, 8):
        for t in range(preferred, 0, -1):
            if dim % t == 0 and t % q == 0:
                return t
    return dim


# ---------------------------------------------------------------------------
# Kernel 1: grouped dense layer  y[g] = x[g or 0] @ W[g] + b[g]
# Weights are already transposed to (d_in, d_out); g indexes the {q,k,v} groups
# (or g=0 only, for the output projection).
# ---------------------------------------------------------------------------
def _grouped_linear_kernel(x_ref, w_ref, b_ref, o_ref):
    # x_ref: (tn, d_in) bf16, w_ref: (d_in, td) bf16, b_ref: (1, td) f32
    acc = lax.dot_general(
        x_ref[...], w_ref[...],
        dimension_numbers=(((1,), (0,)), ((), ())),   # natural (M,K)x(K,N) on MXU
        preferred_element_type=jnp.float32)            # f32 accumulation
    o_ref[...] = (acc + b_ref[...]).astype(o_ref.dtype)


def grouped_linear_pallas(x, w, b, *, out_dtype=jnp.bfloat16,
                          tile_n=512, tile_dout=512):
    """x: (Gx, N, d_in) with Gx in {1, G} (Gx=1 broadcasts x over the G groups),
    w: (G, d_in, d_out) bf16, b: (G, 1, d_out) f32 -> (G, N, d_out)."""
    Gx, n, d_in = x.shape
    G, _, d_out = w.shape
    assert Gx in (1, G)

    tn = _pick_tile(n, tile_n, quantum=16)
    td = _pick_tile(d_out, tile_dout, quantum=128)   # lane dim of the output

    x = x.astype(jnp.bfloat16)
    w = w.astype(jnp.bfloat16)
    b = b.astype(jnp.float32)

    if Gx == 1:
        x_index = lambda g, j, i: (0, i, 0)          # shared activations (self-attn)
    else:
        x_index = lambda g, j, i: (g, i, 0)

    out_itemsize = jnp.dtype(out_dtype).itemsize
    flops = 2 * G * n * d_in * d_out
    # Weight tiles DMA'd once per (g, j); x re-read (d_out // td) times per group.
    bytes_accessed = (G * d_in * d_out * 2
                      + G * (d_out // td) * n * d_in * 2
                      + G * d_out * 4
                      + G * n * d_out * out_itemsize)

    # Weight-stationary grid: row tiles (i) innermost so the (d_in, td) weight tile
    # stays resident across all row tiles of a (group, column) pair.
    return pl.pallas_call(
        _grouped_linear_kernel,
        out_shape=jax.ShapeDtypeStruct((G, n, d_out), out_dtype),
        grid=(G, d_out // td, n // tn),
        in_specs=[
            pl.BlockSpec((None, tn, d_in), x_index),
            pl.BlockSpec((None, d_in, td), lambda g, j, i: (g, 0, j)),
            pl.BlockSpec((None, 1, td), lambda g, j, i: (g, 0, j)),
        ],
        out_specs=pl.BlockSpec((None, tn, td), lambda g, j, i: (g, i, j)),
        compiler_params=pltpu.CompilerParams(
            dimension_semantics=("parallel", "parallel", "parallel")),
        cost_estimate=pl.CostEstimate(
            flops=int(flops), transcendentals=0, bytes_accessed=int(bytes_accessed)),
    )(x, w, b)


# ---------------------------------------------------------------------------
# Kernel 2: flash-style multi-head attention on (B, S, d_model) layout.
# Heads live in contiguous lane ranges [h*d_k, (h+1)*d_k) of the last dim; the
# 1/sqrt(d_k) scale is already folded into the Q projection.
# ---------------------------------------------------------------------------
def _flash_mha_kernel(q_ref, k_ref, v_ref, o_ref, m_sc, l_sc, acc_sc, *,
                      head_num, d_k):
    kv_idx = pl.program_id(2)
    tq = q_ref.shape[0]

    @pl.when(kv_idx == 0)
    def _init():
        m_sc[...] = jnp.full_like(m_sc, -jnp.inf)
        l_sc[...] = jnp.zeros_like(l_sc)
        acc_sc[...] = jnp.zeros_like(acc_sc)

    m_prev = m_sc[...]                                   # (tq, H) — one full load
    l_prev = l_sc[...]                                   # (tq, H)
    ones_kv = jnp.ones((k_ref.shape[0], 1), jnp.bfloat16)

    m_parts, l_parts, pv_parts, alpha_parts = [], [], [], []
    for h in range(head_num):                            # static unroll over heads
        c0 = h * d_k
        c1 = c0 + d_k
        q_h = q_ref[:, c0:c1]                            # (tq, d_k) bf16, pre-scaled
        k_h = k_ref[:, c0:c1]                            # (tkv, d_k) bf16
        v_h = v_ref[:, c0:c1]                            # (tkv, d_k) bf16

        # Q @ K^T without materializing a transpose (contract last dims).
        s = lax.dot_general(
            q_h, k_h, dimension_numbers=(((1,), (1,)), ((), ())),
            preferred_element_type=jnp.float32)          # (tq, tkv) f32

        m_prev_h = m_prev[:, h:h + 1]
        m_new_h = jnp.maximum(m_prev_h, jnp.max(s, axis=-1, keepdims=True))
        alpha_h = jnp.exp(m_prev_h - m_new_h)            # (tq, 1)
        p = jnp.exp(s - m_new_h)                         # (tq, tkv) f32
        p_b = p.astype(jnp.bfloat16)

        pv_h = lax.dot_general(
            p_b, v_h, dimension_numbers=(((1,), (0,)), ((), ())),
            preferred_element_type=jnp.float32)          # (tq, d_k)
        # Softmax row-sum on the MXU (p @ 1) instead of a second XLU reduce.
        sum_h = lax.dot_general(
            p_b, ones_kv, dimension_numbers=(((1,), (0,)), ((), ())),
            preferred_element_type=jnp.float32)          # (tq, 1)

        m_parts.append(m_new_h)
        l_parts.append(alpha_h * l_prev[:, h:h + 1] + sum_h)
        pv_parts.append(pv_h)
        alpha_parts.append(jnp.broadcast_to(alpha_h, (tq, d_k)))

    # Single full-lane stores per KV step (no per-head masked partial stores).
    m_sc[...] = jnp.concatenate(m_parts, axis=-1)
    l_sc[...] = jnp.concatenate(l_parts, axis=-1)
    alpha_full = jnp.concatenate(alpha_parts, axis=-1)   # (tq, d_model)
    pv_full = jnp.concatenate(pv_parts, axis=-1)         # (tq, d_model)
    acc_sc[...] = alpha_full * acc_sc[...] + pv_full

    @pl.when(kv_idx == pl.num_programs(2) - 1)
    def _finalize():
        inv_l = pl.reciprocal(l_sc[...], approx=True)    # (tq, H), EUP slot
        inv_full = jnp.concatenate(
            [jnp.broadcast_to(inv_l[:, h:h + 1], (tq, d_k))
             for h in range(head_num)], axis=-1)         # (tq, d_model)
        o_ref[...] = (acc_sc[...] * inv_full).astype(o_ref.dtype)


def attention_pallas(qkv, head_num, *, tile_q=256, tile_kv=256):
    """qkv: (3, B, S, d_model) bf16 (q/k/v stacked on the leading axis, heads in
    contiguous lane ranges) -> (B, S, d_model) bf16 (heads concatenated)."""
    _, B, S, d_model = qkv.shape
    assert d_model % head_num == 0
    d_k = d_model // head_num

    tq = _pick_tile(S, tile_q, quantum=16)
    tkv = _pick_tile(S, tile_kv, quantum=16)
    n_q, n_kv = S // tq, S // tkv

    kernel = functools.partial(_flash_mha_kernel, head_num=head_num, d_k=d_k)

    flops = 4 * B * head_num * S * S * d_k + 2 * B * head_num * S * S
    transcendentals = B * head_num * S * S
    bytes_accessed = (B * S * d_model * 2                # q read once
                      + 2 * n_q * B * S * d_model * 2    # k, v re-read per q tile
                      + B * S * d_model * 2)             # output

    return pl.pallas_call(
        kernel,
        out_shape=jax.ShapeDtypeStruct((B, S, d_model), jnp.bfloat16),
        grid=(B, n_q, n_kv),
        in_specs=[
            pl.BlockSpec((None, None, tq, d_model), lambda b, i, j: (0, b, i, 0)),
            pl.BlockSpec((None, None, tkv, d_model), lambda b, i, j: (1, b, j, 0)),
            pl.BlockSpec((None, None, tkv, d_model), lambda b, i, j: (2, b, j, 0)),
        ],
        # Lane-dense (d_model-wide) output block, constant across the KV axis.
        out_specs=pl.BlockSpec((None, tq, d_model), lambda b, i, j: (b, i, 0)),
        scratch_shapes=[
            pltpu.VMEM((tq, head_num), jnp.float32),     # running max per head
            pltpu.VMEM((tq, head_num), jnp.float32),     # running sum per head
            pltpu.VMEM((tq, d_model), jnp.float32),      # un-normalized accumulator
        ],
        compiler_params=pltpu.CompilerParams(
            dimension_semantics=("parallel", "parallel", "arbitrary")),
        cost_estimate=pl.CostEstimate(
            flops=int(flops), transcendentals=int(transcendentals),
            bytes_accessed=int(bytes_accessed)),
    )(qkv, qkv, qkv)


# ---------------------------------------------------------------------------
# Parameter prep (one-time) + MultiHeadAttention forward
# ---------------------------------------------------------------------------
def prepare_mha_params(params, head_num):
    """Transpose weights to (d_in, d_out), fold 1/sqrt(d_k) into the Q projection,
    stack the q/k/v groups and pre-cast to bf16.  Done once, outside the hot path."""
    d_model = params["w_q"].shape[0]
    d_k = d_model // head_num
    scale = 1.0 / math.sqrt(d_k)
    w_qkv = jnp.stack([params["w_q"].T * scale,
                       params["w_k"].T,
                       params["w_v"].T], axis=0).astype(jnp.bfloat16)   # (3, d, d)
    b_qkv = jnp.stack([params["b_q"] * scale,
                       params["b_k"],
                       params["b_v"]],
                      axis=0).reshape(3, 1, d_model).astype(jnp.float32)
    w_o = params["w_o"].T[None].astype(jnp.bfloat16)                    # (1, d, d)
    b_o = params["b_o"].reshape(1, 1, d_model).astype(jnp.float32)
    return {"w_qkv": w_qkv, "b_qkv": b_qkv, "w_o": w_o, "b_o": b_o}


def multi_head_attention(prepared, query, key, value, head_num,
                         attn_tile_q=256, attn_tile_kv=256):
    B, S, d_model = query.shape
    assert d_model % head_num == 0

    if (query is key) and (key is value):
        # Self-attention fast path: a single activation tensor; the projection
        # kernel broadcasts it over the 3 weight groups (no stack HBM round trip).
        x = query.reshape(1, B * S, d_model).astype(jnp.bfloat16)
    else:
        # Cross-attention: stack activations on the group axis.
        x = jnp.stack([query.reshape(B * S, d_model),
                       key.reshape(B * S, d_model),
                       value.reshape(B * S, d_model)], axis=0).astype(jnp.bfloat16)

    qkv = grouped_linear_pallas(x, prepared["w_qkv"], prepared["b_qkv"],
                                out_dtype=jnp.bfloat16)          # (3, B*S, d_model)

    # Leading-dim-only reshape (no data movement) feeds attention directly.
    attn = attention_pallas(qkv.reshape(3, B, S, d_model), head_num,
                            tile_q=attn_tile_q, tile_kv=attn_tile_kv)

    out = grouped_linear_pallas(attn.reshape(1, B * S, d_model),
                                prepared["w_o"], prepared["b_o"],
                                out_dtype=jnp.float32)           # (1, B*S, d_model)
    return out[0].reshape(B, S, d_model)


# ---------------------------------------------------------------------------
# Pure-JAX (f32) reference for sanity checking (uses the raw PyTorch-style params)
# ---------------------------------------------------------------------------
def multi_head_attention_ref(params, query, key, value, head_num):
    B, S, d_model = query.shape
    d_k = d_model // head_num

    def lin(x, w, b):
        return x @ w.T + b

    def proj(x, w, b):
        y = lin(x, w, b).reshape(B, S, head_num, d_k)
        return jnp.transpose(y, (0, 2, 1, 3))

    q = proj(query, params["w_q"], params["b_q"])
    k = proj(key, params["w_k"], params["b_k"])
    v = proj(value, params["w_v"], params["b_v"])
    s = jnp.einsum("bhqd,bhkd->bhqk", q, k) / math.sqrt(d_k)
    p = jax.nn.softmax(s, axis=-1)
    o = jnp.einsum("bhqk,bhkd->bhqd", p, v)
    o = jnp.transpose(o, (0, 2, 1, 3)).reshape(B, S, d_model)
    return lin(o, params["w_o"], params["b_o"])


if __name__ == "__main__":
    def init_linear(kw, kb, d):
        bnd = 1.0 / math.sqrt(d)
        w = jax.random.uniform(kw, (d, d), jnp.float32, -bnd, bnd)
        b = jax.random.uniform(kb, (d,), jnp.float32, -bnd, bnd)
        return w, b

    # ---- Test 1: tiny shapes, distinct q/k/v (exercises the stacked-x path) ---
    B, S, D_MODEL, HEADS = 2, 8, 32, 4
    keys = jax.random.split(jax.random.PRNGKey(0), 12)

    params = {}
    params["w_q"], params["b_q"] = init_linear(keys[0], keys[1], D_MODEL)
    params["w_k"], params["b_k"] = init_linear(keys[2], keys[3], D_MODEL)
    params["w_v"], params["b_v"] = init_linear(keys[4], keys[5], D_MODEL)
    params["w_o"], params["b_o"] = init_linear(keys[6], keys[7], D_MODEL)
    prepared = prepare_mha_params(params, HEADS)

    query = jax.random.normal(keys[8], (B, S, D_MODEL), jnp.float32)
    key_in = jax.random.normal(keys[9], (B, S, D_MODEL), jnp.float32)
    value = jax.random.normal(keys[10], (B, S, D_MODEL), jnp.float32)

    mha = jax.jit(functools.partial(multi_head_attention, head_num=HEADS))
    out = jax.block_until_ready(mha(prepared, query, key_in, value))
    ref = multi_head_attention_ref(params, query, key_in, value, HEADS)
    assert out.shape == (B, S, D_MODEL)
    # bf16 MXU operands (f32 accumulation) => loosened tolerance vs f32 reference.
    assert jnp.allclose(out, ref, atol=5e-2, rtol=5e-2), (
        f"mismatch vs JAX reference, max abs err={jnp.max(jnp.abs(out - ref))}")

    # ---- Test 2: larger self-attention exercising the tiled flash path --------
    B2, S2, D2, H2 = 2, 256, 256, 8
    k2 = jax.random.split(jax.random.PRNGKey(1), 10)
    params2 = {}
    params2["w_q"], params2["b_q"] = init_linear(k2[0], k2[1], D2)
    params2["w_k"], params2["b_k"] = init_linear(k2[2], k2[3], D2)
    params2["w_v"], params2["b_v"] = init_linear(k2[4], k2[5], D2)
    params2["w_o"], params2["b_o"] = init_linear(k2[6], k2[7], D2)
    prepared2 = prepare_mha_params(params2, H2)
    x2 = jax.random.normal(k2[8], (B2, S2, D2), jnp.float32)

    # Passing the same tensor three times inside the trace triggers the shared-x
    # (no-stack) self-attention path.
    mha2 = jax.jit(lambda p, x: multi_head_attention(
        p, x, x, x, H2, attn_tile_q=128, attn_tile_kv=128))
    out2 = jax.block_until_ready(mha2(prepared2, x2))
    ref2 = multi_head_attention_ref(params2, x2, x2, x2, H2)
    assert out2.shape == (B2, S2, D2)
    assert jnp.allclose(out2, ref2, atol=5e-2, rtol=5e-2), (
        f"mismatch vs JAX reference (tiled), max abs err={jnp.max(jnp.abs(out2 - ref2))}")

    print("KERNEL_OK")
</pallas_src>

<mosaic_0001>
module attributes {stable_mosaic.version = 11 : i64} {
  func.func @_grouped_linear_kernel(%arg0: i32, %arg1: i32, %arg2: i32, %arg3: memref<1x16x32xbf16, #tpu.memory_space<vmem>>, %arg4: memref<1x32x32xbf16, #tpu.memory_space<vmem>>, %arg5: memref<1x1x32xf32, #tpu.memory_space<vmem>>, %arg6: memref<1x16x32xbf16, #tpu.memory_space<vmem>>) attributes {dimension_semantics = [#tpu.dimension_semantics<parallel>, #tpu.dimension_semantics<parallel>, #tpu.dimension_semantics<parallel>], iteration_bounds = array<i64: 3, 1, 1>, scalar_prefetch = 0 : i64, scratch_operands = 0 : i64, tpu.core_type = #tpu.core_type<tc>, window_params = [{transform_indices = @transform_0, window_bounds = array<i64: 1, 16, 32>}, {transform_indices = @transform_1, window_bounds = array<i64: 1, 32, 32>}, {transform_indices = @transform_2, window_bounds = array<i64: 1, 1, 32>}, {transform_indices = @transform_3, window_bounds = array<i64: 1, 16, 32>}]} {
    %c0 = arith.constant 0 : index
    %c0_0 = arith.constant 0 : index
    %c0_1 = arith.constant 0 : index
    %0 = vector.load %arg3[%c0, %c0_0, %c0_1] : memref<1x16x32xbf16, #tpu.memory_space<vmem>>, vector<1x16x32xbf16>
    %1 = vector.shape_cast %0 : vector<1x16x32xbf16> to vector<16x32xbf16>
    %c0_2 = arith.constant 0 : index
    %c0_3 = arith.constant 0 : index
    %c0_4 = arith.constant 0 : index
    %2 = vector.load %arg4[%c0_2, %c0_3, %c0_4] : memref<1x32x32xbf16, #tpu.memory_space<vmem>>, vector<1x32x32xbf16>
    %3 = vector.shape_cast %2 : vector<1x32x32xbf16> to vector<32x32xbf16>
    %cst = arith.constant dense<0.000000e+00> : vector<16x32xf32>
    %4 = tpu.matmul %1, %3, %cst {dimension_numbers = #tpu.dot_dimension_numbers<[1], [0], [0], [1], [0, 0, 1, 1], [], []>} : vector<16x32xbf16>, vector<32x32xbf16>, vector<16x32xf32> -> vector<16x32xf32>
    %c0_5 = arith.constant 0 : index
    %c0_6 = arith.constant 0 : index
    %c0_7 = arith.constant 0 : index
    %5 = vector.load %arg5[%c0_5, %c0_6, %c0_7] : memref<1x1x32xf32, #tpu.memory_space<vmem>>, vector<1x1x32xf32>
    %6 = vector.shape_cast %5 : vector<1x1x32xf32> to vector<1x32xf32>
    %7 = vector.broadcast %6 : vector<1x32xf32> to vector<16x32xf32>
    %8 = arith.addf %4, %7 : vector<16x32xf32>
    %9 = arith.truncf %8 : vector<16x32xf32> to vector<16x32xbf16>
    %c0_8 = arith.constant 0 : index
    %c0_9 = arith.constant 0 : index
    %c0_10 = arith.constant 0 : index
    %10 = vector.load %arg6[%c0_8, %c0_9, %c0_10] : memref<1x16x32xbf16, #tpu.memory_space<vmem>>, vector<1x16x32xbf16>
    %11 = vector.shape_cast %10 : vector<1x16x32xbf16> to vector<16x32xbf16>
    %12 = vector.shape_cast %9 : vector<16x32xbf16> to vector<1x16x32xbf16>
    tpu.vector_store %arg6[%c0_8, %c0_9, %c0_10], %12 {strides = array<i32>} : memref<1x16x32xbf16, #tpu.memory_space<vmem>>, vector<1x16x32xbf16>,
    return
  }
  func.func @transform_0(%arg0: i32, %arg1: i32, %arg2: i32) -> (i32, i32, i32) {
    %c0_i32 = arith.constant 0 : i32
    %c0_i32_0 = arith.constant 0 : i32
    return %arg0, %arg2, %c0_i32 : i32, i32, i32
  }
  func.func @transform_1(%arg0: i32, %arg1: i32, %arg2: i32) -> (i32, i32, i32) {
    %c0_i32 = arith.constant 0 : i32
    %c0_i32_0 = arith.constant 0 : i32
    return %arg0, %c0_i32, %arg1 : i32, i32, i32
  }
  func.func @transform_2(%arg0: i32, %arg1: i32, %arg2: i32) -> (i32, i32, i32) {
    %c0_i32 = arith.constant 0 : i32
    %c0_i32_0 = arith.constant 0 : i32
    return %arg0, %c0_i32, %arg1 : i32, i32, i32
  }
  func.func @transform_3(%arg0: i32, %arg1: i32, %arg2: i32) -> (i32, i32, i32) {
    %c0_i32 = arith.constant 0 : i32
    return %arg0, %arg2, %arg1 : i32, i32, i32
  }
}

module attributes {stable_mosaic.version = 11 : i64} {
  func.func @_grouped_linear_kernel(%arg0: i32, %arg1: i32, %arg2: i32, %arg3: memref<1x16x32xbf16, #tpu.memory_space<vmem>>, %arg4: memref<1x32x32xbf16, #tpu.memory_space<vmem>>, %arg5: memref<1x1x32xf32, #tpu.memory_space<vmem>>, %arg6: memref<1x16x32xf32, #tpu.memory_space<vmem>>) attributes {dimension_semantics = [#tpu.dimension_semantics<parallel>, #tpu.dimension_semantics<parallel>, #tpu.dimension_semantics<parallel>], iteration_bounds = array<i64: 1, 1, 1>, scalar_prefetch = 0 : i64, scratch_operands = 0 : i64, tpu.core_type = #tpu.core_type<tc>, window_params = [{transform_indices = @transform_0, window_bounds = array<i64: 1, 16, 32>}, {transform_indices = @transform_1, window_bounds = array<i64: 1, 32, 32>}, {transform_indices = @transform_2, window_bounds = array<i64: 1, 1, 32>}, {transform_indices = @transform_3, window_bounds = array<i64: 1, 16, 32>}]} {
    %c0 = arith.constant 0 : index
    %c0_0 = arith.constant 0 : index
    %c0_1 = arith.constant 0 : index
    %0 = vector.load %arg3[%c0, %c0_0, %c0_1] : memref<1x16x32xbf16, #tpu.memory_space<vmem>>, vector<1x16x32xbf16>
    %1 = vector.shape_cast %0 : vector<1x16x32xbf16> to vector<16x32xbf16>
    %c0_2 = arith.constant 0 : index
    %c0_3 = arith.constant 0 : index
    %c0_4 = arith.constant 0 : index
    %2 = vector.load %arg4[%c0_2, %c0_3, %c0_4] : memref<1x32x32xbf16, #tpu.memory_space<vmem>>, vector<1x32x32xbf16>
    %3 = vector.shape_cast %2 : vector<1x32x32xbf16> to vector<32x32xbf16>
    %cst = arith.constant dense<0.000000e+00> : vector<16x32xf32>
    %4 = tpu.matmul %1, %3, %cst {dimension_numbers = #tpu.dot_dimension_numbers<[1], [0], [0], [1], [0, 0, 1, 1], [], []>} : vector<16x32xbf16>, vector<32x32xbf16>, vector<16x32xf32> -> vector<16x32xf32>
    %c0_5 = arith.constant 0 : index
    %c0_6 = arith.constant 0 : index
    %c0_7 = arith.constant 0 : index
    %5 = vector.load %arg5[%c0_5, %c0_6, %c0_7] : memref<1x1x32xf32, #tpu.memory_space<vmem>>, vector<1x1x32xf32>
    %6 = vector.shape_cast %5 : vector<1x1x32xf32> to vector<1x32xf32>
    %7 = vector.broadcast %6 : vector<1x32xf32> to vector<16x32xf32>
    %8 = arith.addf %4, %7 : vector<16x32xf32>
    %c0_8 = arith.constant 0 : index
    %c0_9 = arith.constant 0 : index
    %c0_10 = arith.constant 0 : index
    %9 = vector.load %arg6[%c0_8, %c0_9, %c0_10] : memref<1x16x32xf32, #tpu.memory_space<vmem>>, vector<1x16x32xf32>
    %10 = vector.shape_cast %9 : vector<1x16x32xf32> to vector<16x32xf32>
    %11 = vector.shape_cast %8 : vector<16x32xf32> to vector<1x16x32xf32>
    tpu.vector_store %arg6[%c0_8, %c0_9, %c0_10], %11 {strides = array<i32>} : memref<1x16x32xf32, #tpu.memory_space<vmem>>, vector<1x16x32xf32>,
    return
  }
  func.func @transform_0(%arg0: i32, %arg1: i32, %arg2: i32) -> (i32, i32, i32) {
    %c0_i32 = arith.constant 0 : i32
    %c0_i32_0 = arith.constant 0 : i32
    %c0_i32_1 = arith.constant 0 : i32
    return %c0_i32, %arg2, %c0_i32_0 : i32, i32, i32
  }
  func.func @transform_1(%arg0: i32, %arg1: i32, %arg2: i32) -> (i32, i32, i32) {
    %c0_i32 = arith.constant 0 : i32
    %c0_i32_0 = arith.constant 0 : i32
    return %arg0, %c0_i32, %arg1 : i32, i32, i32
  }
  func.func @transform_2(%arg0: i32, %arg1: i32, %arg2: i32) -> (i32, i32, i32) {
    %c0_i32 = arith.constant 0 : i32
    %c0_i32_0 = arith.constant 0 : i32
    return %arg0, %c0_i32, %arg1 : i32, i32, i32
  }
  func.func @transform_3(%arg0: i32, %arg1: i32, %arg2: i32) -> (i32, i32, i32) {
    %c0_i32 = arith.constant 0 : i32
    return %arg0, %arg2, %arg1 : i32, i32, i32
  }
}

module attributes {stable_mosaic.version = 11 : i64} {
  func.func @_flash_mha_kernel(%arg0: i32, %arg1: i32, %arg2: i32, %arg3: memref<1x1x8x32xbf16, #tpu.memory_space<vmem>>, %arg4: memref<1x1x8x32xbf16, #tpu.memory_space<vmem>>, %arg5: memref<1x1x8x32xbf16, #tpu.memory_space<vmem>>, %arg6: memref<1x8x32xbf16, #tpu.memory_space<vmem>>, %arg7: memref<8x4xf32, #tpu.memory_space<vmem>>, %arg8: memref<8x4xf32, #tpu.memory_space<vmem>>, %arg9: memref<8x32xf32, #tpu.memory_space<vmem>>) attributes {dimension_semantics = [#tpu.dimension_semantics<parallel>, #tpu.dimension_semantics<parallel>, #tpu.dimension_semantics<arbitrary>], iteration_bounds = array<i64: 2, 1, 1>, scalar_prefetch = 0 : i64, scratch_operands = 3 : i64, tpu.core_type = #tpu.core_type<tc>, window_params = [{transform_indices = @transform_0, window_bounds = array<i64: 1, 1, 8, 32>}, {transform_indices = @transform_1, window_bounds = array<i64: 1, 1, 8, 32>}, {transform_indices = @transform_2, window_bounds = array<i64: 1, 1, 8, 32>}, {transform_indices = @transform_3, window_bounds = array<i64: 1, 8, 32>}]} {
    %c0_i32 = arith.constant 0 : i32
    %0 = arith.cmpi eq, %arg2, %c0_i32 : i32
    %1 = arith.extui %0 : i1 to i32
    %c0_i32_0 = arith.constant 0 : i32
    %2 = arith.cmpi ne, %1, %c0_i32_0 : i32
    scf.if %2 {
      %cst_75 = arith.constant 0xFF800000 : f32
      %115 = vector.broadcast %cst_75 : f32 to vector<8x4xf32>
      %c0_76 = arith.constant 0 : index
      %c0_77 = arith.constant 0 : index
      %116 = vector.load %arg7[%c0_76, %c0_77] : memref<8x4xf32, #tpu.memory_space<vmem>>, vector<8x4xf32>
      tpu.vector_store %arg7[%c0_76, %c0_77], %115 {strides = array<i32>} : memref<8x4xf32, #tpu.memory_space<vmem>>, vector<8x4xf32>,
      %cst_78 = arith.constant 0.000000e+00 : f32
      %117 = vector.broadcast %cst_78 : f32 to vector<8x4xf32>
      %c0_79 = arith.constant 0 : index
      %c0_80 = arith.constant 0 : index
      %118 = vector.load %arg8[%c0_79, %c0_80] : memref<8x4xf32, #tpu.memory_space<vmem>>, vector<8x4xf32>
      tpu.vector_store %arg8[%c0_79, %c0_80], %117 {strides = array<i32>} : memref<8x4xf32, #tpu.memory_space<vmem>>, vector<8x4xf32>,
      %cst_81 = arith.constant 0.000000e+00 : f32
      %119 = vector.broadcast %cst_81 : f32 to vector<8x32xf32>
      %c0_82 = arith.constant 0 : index
      %c0_83 = arith.constant 0 : index
      %120 = vector.load %arg9[%c0_82, %c0_83] : memref<8x32xf32, #tpu.memory_space<vmem>>, vector<8x32xf32>
      tpu.vector_store %arg9[%c0_82, %c0_83], %119 {strides = array<i32>} : memref<8x32xf32, #tpu.memory_space<vmem>>, vector<8x32xf32>,
    } else {
    }
    %c0 = arith.constant 0 : index
    %c0_1 = arith.constant 0 : index
    %3 = vector.load %arg7[%c0, %c0_1] : memref<8x4xf32, #tpu.memory_space<vmem>>, vector<8x4xf32>
    %c0_2 = arith.constant 0 : index
    %c0_3 = arith.constant 0 : index
    %4 = vector.load %arg8[%c0_2, %c0_3] : memref<8x4xf32, #tpu.memory_space<vmem>>, vector<8x4xf32>
    %cst = arith.constant 1.000000e+00 : bf16
    %5 = vector.broadcast %cst : bf16 to vector<8x1xbf16>
    %c0_4 = arith.constant 0 : index
    %c0_5 = arith.constant 0 : index
    %c0_6 = arith.constant 0 : index
    %c0_7 = arith.constant 0 : index
    %6 = vector.load %arg3[%c0_4, %c0_5, %c0_6, %c0_7] : memref<1x1x8x32xbf16, #tpu.memory_space<vmem>>, vector<1x1x8x8xbf16>
    %7 = vector.shape_cast %6 : vector<1x1x8x8xbf16> to vector<8x8xbf16>
    %c0_8 = arith.constant 0 : index
    %c0_9 = arith.constant 0 : index
    %c0_10 = arith.constant 0 : index
    %c0_11 = arith.constant 0 : index
    %8 = vector.load %arg4[%c0_8, %c0_9, %c0_10, %c0_11] : memref<1x1x8x32xbf16, #tpu.memory_space<vmem>>, vector<1x1x8x8xbf16>
    %9 = vector.shape_cast %8 : vector<1x1x8x8xbf16> to vector<8x8xbf16>
    %c0_12 = arith.constant 0 : index
    %c0_13 = arith.constant 0 : index
    %c0_14 = arith.constant 0 : index
    %c0_15 = arith.constant 0 : index
    %10 = vector.load %arg5[%c0_12, %c0_13, %c0_14, %c0_15] : memref<1x1x8x32xbf16, #tpu.memory_space<vmem>>, vector<1x1x8x8xbf16>
    %11 = vector.shape_cast %10 : vector<1x1x8x8xbf16> to vector<8x8xbf16>
    %cst_16 = arith.constant dense<0.000000e+00> : vector<8x8xf32>
    %12 = tpu.matmul %7, %9, %cst_16 {dimension_numbers = #tpu.dot_dimension_numbers<[1], [1], [0], [0], [0, 0, 1, 0], [], []>} : vector<8x8xbf16>, vector<8x8xbf16>, vector<8x8xf32> -> vector<8x8xf32>
    %13 = vector.extract_strided_slice %3 {offsets = [0, 0], sizes = [8, 1], strides = [1, 1]} : vector<8x4xf32> to vector<8x1xf32>
    %cst_17 = arith.constant dense<0xFF800000> : vector<8xf32>
    %14 = vector.multi_reduction <maximumf>, %12, %cst_17 [1] : vector<8x8xf32> to vector<8xf32>
    %15 = vector.shape_cast %14 : vector<8xf32> to vector<8x1xf32>
    %16 = arith.maximumf %13, %15 : vector<8x1xf32>
    %17 = arith.subf %13, %16 : vector<8x1xf32>
    %18 = math.exp %17 : vector<8x1xf32>
    %19 = vector.broadcast %16 : vector<8x1xf32> to vector<8x8xf32>
    %20 = arith.subf %12, %19 : vector<8x8xf32>
    %21 = math.exp %20 : vector<8x8xf32>
    %22 = arith.truncf %21 : vector<8x8xf32> to vector<8x8xbf16>
    %cst_18 = arith.constant dense<0.000000e+00> : vector<8x8xf32>
    %23 = tpu.matmul %22, %11, %cst_18 {dimension_numbers = #tpu.dot_dimension_numbers<[1], [0], [0], [1], [0, 0, 1, 1], [], []>} : vector<8x8xbf16>, vector<8x8xbf16>, vector<8x8xf32> -> vector<8x8xf32>
    %cst_19 = arith.constant dense<0.000000e+00> : vector<8x1xf32>
    %24 = tpu.matmul %22, %5, %cst_19 {dimension_numbers = #tpu.dot_dimension_numbers<[1], [0], [0], [1], [0, 0, 1, 1], [], []>} : vector<8x8xbf16>, vector<8x1xbf16>, vector<8x1xf32> -> vector<8x1xf32>
    %25 = vector.extract_strided_slice %4 {offsets = [0, 0], sizes = [8, 1], strides = [1, 1]} : vector<8x4xf32> to vector<8x1xf32>
    %26 = arith.mulf %18, %25 : vector<8x1xf32>
    %27 = arith.addf %26, %24 : vector<8x1xf32>
    %28 = vector.shape_cast %18 : vector<8x1xf32> to vector<8x1xf32>
    %29 = vector.broadcast %28 : vector<8x1xf32> to vector<8x8xf32>
    %c0_20 = arith.constant 0 : index
    %c0_21 = arith.constant 0 : index
    %c0_22 = arith.constant 0 : index
    %c8 = arith.constant 8 : index
    %30 = vector.load %arg3[%c0_20, %c0_21, %c0_22, %c8] : memref<1x1x8x32xbf16, #tpu.memory_space<vmem>>, vector<1x1x8x8xbf16>
    %31 = vector.shape_cast %30 : vector<1x1x8x8xbf16> to vector<8x8xbf16>
    %c0_23 = arith.constant 0 : index
    %c0_24 = arith.constant 0 : index
    %c0_25 = arith.constant 0 : index
    %c8_26 = arith.constant 8 : index
    %32 = vector.load %arg4[%c0_23, %c0_24, %c0_25, %c8_26] : memref<1x1x8x32xbf16, #tpu.memory_space<vmem>>, vector<1x1x8x8xbf16>
    %33 = vector.shape_cast %32 : vector<1x1x8x8xbf16> to vector<8x8xbf16>
    %c0_27 = arith.constant 0 : index
    %c0_28 = arith.constant 0 : index
    %c0_29 = arith.constant 0 : index
    %c8_30 = arith.constant 8 : index
    %34 = vector.load %arg5[%c0_27, %c0_28, %c0_29, %c8_30] : memref<1x1x8x32xbf16, #tpu.memory_space<vmem>>, vector<1x1x8x8xbf16>
    %35 = vector.shape_cast %34 : vector<1x1x8x8xbf16> to vector<8x8xbf16>
    %cst_31 = arith.constant dense<0.000000e+00> : vector<8x8xf32>
    %36 = tpu.matmul %31, %33, %cst_31 {dimension_numbers = #tpu.dot_dimension_numbers<[1], [1], [0], [0], [0, 0, 1, 0], [], []>} : vector<8x8xbf16>, vector<8x8xbf16>, vector<8x8xf32> -> vector<8x8xf32>
    %37 = vector.extract_strided_slice %3 {offsets = [0, 1], sizes = [8, 1], strides = [1, 1]} : vector<8x4xf32> to vector<8x1xf32>
    %cst_32 = arith.constant dense<0xFF800000> : vector<8xf32>
    %38 = vector.multi_reduction <maximumf>, %36, %cst_32 [1] : vector<8x8xf32> to vector<8xf32>
    %39 = vector.shape_cast %38 : vector<8xf32> to vector<8x1xf32>
    %40 = arith.maximumf %37, %39 : vector<8x1xf32>
    %41 = arith.subf %37, %40 : vector<8x1xf32>
    %42 = math.exp %41 : vector<8x1xf32>
    %43 = vector.broadcast %40 : vector<8x1xf32> to vector<8x8xf32>
    %44 = arith.subf %36, %43 : vector<8x8xf32>
    %45 = math.exp %44 : vector<8x8xf32>
    %46 = arith.truncf %45 : vector<8x8xf32> to vector<8x8xbf16>
    %cst_33 = arith.constant dense<0.000000e+00> : vector<8x8xf32>
    %47 = tpu.matmul %46, %35, %cst_33 {dimension_numbers = #tpu.dot_dimension_numbers<[1], [0], [0], [1], [0, 0, 1, 1], [], []>} : vector<8x8xbf16>, vector<8x8xbf16>, vector<8x8xf32> -> vector<8x8xf32>
    %cst_34 = arith.constant dense<0.000000e+00> : vector<8x1xf32>
    %48 = tpu.matmul %46, %5, %cst_34 {dimension_numbers = #tpu.dot_dimension_numbers<[1], [0], [0], [1], [0, 0, 1, 1], [], []>} : vector<8x8xbf16>, vector<8x1xbf16>, vector<8x1xf32> -> vector<8x1xf32>
    %49 = vector.extract_strided_slice %4 {offsets = [0, 1], sizes = [8, 1], strides = [1, 1]} : vector<8x4xf32> to vector<8x1xf32>
    %50 = arith.mulf %42, %49 : vector<8x1xf32>
    %51 = arith.addf %50, %48 : vector<8x1xf32>
    %52 = vector.shape_cast %42 : vector<8x1xf32> to vector<8x1xf32>
    %53 = vector.broadcast %52 : vector<8x1xf32> to vector<8x8xf32>
    %c0_35 = arith.constant 0 : index
    %c0_36 = arith.constant 0 : index
    %c0_37 = arith.constant 0 : index
    %c16 = arith.constant 16 : index
    %54 = vector.load %arg3[%c0_35, %c0_36, %c0_37, %c16] : memref<1x1x8x32xbf16, #tpu.memory_space<vmem>>, vector<1x1x8x8xbf16>
    %55 = vector.shape_cast %54 : vector<1x1x8x8xbf16> to vector<8x8xbf16>
    %c0_38 = arith.constant 0 : index
    %c0_39 = arith.constant 0 : index
    %c0_40 = arith.constant 0 : index
    %c16_41 = arith.constant 16 : index
    %56 = vector.load %arg4[%c0_38, %c0_39, %c0_40, %c16_41] : memref<1x1x8x32xbf16, #tpu.memory_space<vmem>>, vector<1x1x8x8xbf16>
    %57 = vector.shape_cast %56 : vector<1x1x8x8xbf16> to vector<8x8xbf16>
    %c0_42 = arith.constant 0 : index
    %c0_43 = arith.constant 0 : index
    %c0_44 = arith.constant 0 : index
    %c16_45 = arith.constant 16 : index
    %58 = vector.load %arg5[%c0_42, %c0_43, %c0_44, %c16_45] : memref<1x1x8x32xbf16, #tpu.memory_space<vmem>>, vector<1x1x8x8xbf16>
    %59 = vector.shape_cast %58 : vector<1x1x8x8xbf16> to vector<8x8xbf16>
    %cst_46 = arith.constant dense<0.000000e+00> : vector<8x8xf32>
    %60 = tpu.matmul %55, %57, %cst_46 {dimension_numbers = #tpu.dot_dimension_numbers<[1], [1], [0], [0], [0, 0, 1, 0], [], []>} : vector<8x8xbf16>, vector<8x8xbf16>, vector<8x8xf32> -> vector<8x8xf32>
    %61 = vector.extract_strided_slice %3 {offsets = [0, 2], sizes = [8, 1], strides = [1, 1]} : vector<8x4xf32> to vector<8x1xf32>
    %cst_47 = arith.constant dense<0xFF800000> : vector<8xf32>
    %62 = vector.multi_reduction <maximumf>, %60, %cst_47 [1] : vector<8x8xf32> to vector<8xf32>
    %63 = vector.shape_cast %62 : vector<8xf32> to vector<8x1xf32>
    %64 = arith.maximumf %61, %63 : vector<8x1xf32>
    %65 = arith.subf %61, %64 : vector<8x1xf32>
    %66 = math.exp %65 : vector<8x1xf32>
    %67 = vector.broadcast %64 : vector<8x1xf32> to vector<8x8xf32>
    %68 = arith.subf %60, %67 : vector<8x8xf32>
    %69 = math.exp %68 : vector<8x8xf32>
    %70 = arith.truncf %69 : vector<8x8xf32> to vector<8x8xbf16>
    %cst_48 = arith.constant dense<0.000000e+00> : vector<8x8xf32>
    %71 = tpu.matmul %70, %59, %cst_48 {dimension_numbers = #tpu.dot_dimension_numbers<[1], [0], [0], [1], [0, 0, 1, 1], [], []>} : vector<8x8xbf16>, vector<8x8xbf16>, vector<8x8xf32> -> vector<8x8xf32>
    %cst_49 = arith.constant dense<0.000000e+00> : vector<8x1xf32>
    %72 = tpu.matmul %70, %5, %cst_49 {dimension_numbers = #tpu.dot_dimension_numbers<[1], [0], [0], [1], [0, 0, 1, 1], [], []>} : vector<8x8xbf16>, vector<8x1xbf16>, vector<8x1xf32> -> vector<8x1xf32>
    %73 = vector.extract_strided_slice %4 {offsets = [0, 2], sizes = [8, 1], strides = [1, 1]} : vector<8x4xf32> to vector<8x1xf32>
    %74 = arith.mulf %66, %73 : vector<8x1xf32>
    %75 = arith.addf %74, %72 : vector<8x1xf32>
    %76 = vector.shape_cast %66 : vector<8x1xf32> to vector<8x1xf32>
    %77 = vector.broadcast %76 : vector<8x1xf32> to vector<8x8xf32>
    %c0_50 = arith.constant 0 : index
    %c0_51 = arith.constant 0 : index
    %c0_52 = arith.constant 0 : index
    %c24 = arith.constant 24 : index
    %78 = vector.load %arg3[%c0_50, %c0_51, %c0_52, %c24] : memref<1x1x8x32xbf16, #tpu.memory_space<vmem>>, vector<1x1x8x8xbf16>
    %79 = vector.shape_cast %78 : vector<1x1x8x8xbf16> to vector<8x8xbf16>
    %c0_53 = arith.constant 0 : index
    %c0_54 = arith.constant 0 : index
    %c0_55 = arith.constant 0 : index
    %c24_56 = arith.constant 24 : index
    %80 = vector.load %arg4[%c0_53, %c0_54, %c0_55, %c24_56] : memref<1x1x8x32xbf16, #tpu.memory_space<vmem>>, vector<1x1x8x8xbf16>
    %81 = vector.shape_cast %80 : vector<1x1x8x8xbf16> to vector<8x8xbf16>
    %c0_57 = arith.constant 0 : index
    %c0_58 = arith.constant 0 : index
    %c0_59 = arith.constant 0 : index
    %c24_60 = arith.constant 24 : index
    %82 = vector.load %arg5[%c0_57, %c0_58, %c0_59, %c24_60] : memref<1x1x8x32xbf16, #tpu.memory_space<vmem>>, vector<1x1x8x8xbf16>
    %83 = vector.shape_cast %82 : vector<1x1x8x8xbf16> to vector<8x8xbf16>
    %cst_61 = arith.constant dense<0.000000e+00> : vector<8x8xf32>
    %84 = tpu.matmul %79, %81, %cst_61 {dimension_numbers = #tpu.dot_dimension_numbers<[1], [1], [0], [0], [0, 0, 1, 0], [], []>} : vector<8x8xbf16>, vector<8x8xbf16>, vector<8x8xf32> -> vector<8x8xf32>
    %85 = vector.extract_strided_slice %3 {offsets = [0, 3], sizes = [8, 1], strides = [1, 1]} : vector<8x4xf32> to vector<8x1xf32>
    %cst_62 = arith.constant dense<0xFF800000> : vector<8xf32>
    %86 = vector.multi_reduction <maximumf>, %84, %cst_62 [1] : vector<8x8xf32> to vector<8xf32>
    %87 = vector.shape_cast %86 : vector<8xf32> to vector<8x1xf32>
    %88 = arith.maximumf %85, %87 : vector<8x1xf32>
    %89 = arith.subf %85, %88 : vector<8x1xf32>
    %90 = math.exp %89 : vector<8x1xf32>
    %91 = vector.broadcast %88 : vector<8x1xf32> to vector<8x8xf32>
    %92 = arith.subf %84, %91 : vector<8x8xf32>
    %93 = math.exp %92 : vector<8x8xf32>
    %94 = arith.truncf %93 : vector<8x8xf32> to vector<8x8xbf16>
    %cst_63 = arith.constant dense<0.000000e+00> : vector<8x8xf32>
    %95 = tpu.matmul %94, %83, %cst_63 {dimension_numbers = #tpu.dot_dimension_numbers<[1], [0], [0], [1], [0, 0, 1, 1], [], []>} : vector<8x8xbf16>, vector<8x8xbf16>, vector<8x8xf32> -> vector<8x8xf32>
    %cst_64 = arith.constant dense<0.000000e+00> : vector<8x1xf32>
    %96 = tpu.matmul %94, %5, %cst_64 {dimension_numbers = #tpu.dot_dimension_numbers<[1], [0], [0], [1], [0, 0, 1, 1], [], []>} : vector<8x8xbf16>, vector<8x1xbf16>, vector<8x1xf32> -> vector<8x1xf32>
    %97 = vector.extract_strided_slice %4 {offsets = [0, 3], sizes = [8, 1], strides = [1, 1]} : vector<8x4xf32> to vector<8x1xf32>
    %98 = arith.mulf %90, %97 : vector<8x1xf32>
    %99 = arith.addf %98, %96 : vector<8x1xf32>
    %100 = vector.shape_cast %90 : vector<8x1xf32> to vector<8x1xf32>
    %101 = vector.broadcast %100 : vector<8x1xf32> to vector<8x8xf32>
    %102 = tpu.concatenate %16, %40, %64, %88 in 1 : vector<8x1xf32>, vector<8x1xf32>, vector<8x1xf32>, vector<8x1xf32> -> vector<8x4xf32>
    %c0_65 = arith.constant 0 : index
    %c0_66 = arith.constant 0 : index
    %103 = vector.load %arg7[%c0_65, %c0_66] : memref<8x4xf32, #tpu.memory_space<vmem>>, vector<8x4xf32>
    tpu.vector_store %arg7[%c0_65, %c0_66], %102 {strides = array<i32>} : memref<8x4xf32, #tpu.memory_space<vmem>>, vector<8x4xf32>,
    %104 = tpu.concatenate %27, %51, %75, %99 in 1 : vector<8x1xf32>, vector<8x1xf32>, vector<8x1xf32>, vector<8x1xf32> -> vector<8x4xf32>
    %c0_67 = arith.constant 0 : index
    %c0_68 = arith.constant 0 : index
    %105 = vector.load %arg8[%c0_67, %c0_68] : memref<8x4xf32, #tpu.memory_space<vmem>>, vector<8x4xf32>
    tpu.vector_store %arg8[%c0_67, %c0_68], %104 {strides = array<i32>} : memref<8x4xf32, #tpu.memory_space<vmem>>, vector<8x4xf32>,
    %106 = tpu.concatenate %29, %53, %77, %101 in 1 : vector<8x8xf32>, vector<8x8xf32>, vector<8x8xf32>, vector<8x8xf32> -> vector<8x32xf32>
    %107 = tpu.concatenate %23, %47, %71, %95 in 1 : vector<8x8xf32>, vector<8x8xf32>, vector<8x8xf32>, vector<8x8xf32> -> vector<8x32xf32>
    %c0_69 = arith.constant 0 : index
    %c0_70 = arith.constant 0 : index
    %108 = vector.load %arg9[%c0_69, %c0_70] : memref<8x32xf32, #tpu.memory_space<vmem>>, vector<8x32xf32>
    %109 = arith.mulf %106, %108 : vector<8x32xf32>
    %110 = arith.addf %109, %107 : vector<8x32xf32>
    %c0_71 = arith.constant 0 : index
    %c0_72 = arith.constant 0 : index
    %111 = vector.load %arg9[%c0_71, %c0_72] : memref<8x32xf32, #tpu.memory_space<vmem>>, vector<8x32xf32>
    tpu.vector_store %arg9[%c0_71, %c0_72], %110 {strides = array<i32>} : memref<8x32xf32, #tpu.memory_space<vmem>>, vector<8x32xf32>,
    %c0_i32_73 = arith.constant 0 : i32
    %112 = arith.cmpi eq, %arg2, %c0_i32_73 : i32
    %113 = arith.extui %112 : i1 to i32
    %c0_i32_74 = arith.constant 0 : i32
    %114 = arith.cmpi ne, %113, %c0_i32_74 : i32
    scf.if %114 {
      %c0_75 = arith.constant 0 : index
      %c0_76 = arith.constant 0 : index
      %115 = vector.load %arg8[%c0_75, %c0_76] : memref<8x4xf32, #tpu.memory_space<vmem>>, vector<8x4xf32>
      %116 = tpu.reciprocal %115 {approx = true} : vector<8x4xf32> -> vector<8x4xf32>
      %117 = vector.extract_strided_slice %116 {offsets = [0, 0], sizes = [8, 1], strides = [1, 1]} : vector<8x4xf32> to vector<8x1xf32>
      %118 = vector.shape_cast %117 : vector<8x1xf32> to vector<8x1xf32>
      %119 = vector.broadcast %118 : vector<8x1xf32> to vector<8x8xf32>
      %120 = vector.extract_strided_slice %116 {offsets = [0, 1], sizes = [8, 1], strides = [1, 1]} : vector<8x4xf32> to vector<8x1xf32>
      %121 = vector.shape_cast %120 : vector<8x1xf32> to vector<8x1xf32>
      %122 = vector.broadcast %121 : vector<8x1xf32> to vector<8x8xf32>
      %123 = vector.extract_strided_slice %116 {offsets = [0, 2], sizes = [8, 1], strides = [1, 1]} : vector<8x4xf32> to vector<8x1xf32>
      %124 = vector.shape_cast %123 : vector<8x1xf32> to vector<8x1xf32>
      %125 = vector.broadcast %124 : vector<8x1xf32> to vector<8x8xf32>
      %126 = vector.extract_strided_slice %116 {offsets = [0, 3], sizes = [8, 1], strides = [1, 1]} : vector<8x4xf32> to vector<8x1xf32>
      %127 = vector.shape_cast %126 : vector<8x1xf32> to vector<8x1xf32>
      %128 = vector.broadcast %127 : vector<8x1xf32> to vector<8x8xf32>
      %129 = tpu.concatenate %119, %122, %125, %128 in 1 : vector<8x8xf32>, vector<8x8xf32>, vector<8x8xf32>, vector<8x8xf32> -> vector<8x32xf32>
      %c0_77 = arith.constant 0 : index
      %c0_78 = arith.constant 0 : index
      %130 = vector.load %arg9[%c0_77, %c0_78] : memref<8x32xf32, #tpu.memory_space<vmem>>, vector<8x32xf32>
      %131 = arith.mulf %130, %129 : vector<8x32xf32>
      %132 = arith.truncf %131 : vector<8x32xf32> to vector<8x32xbf16>
      %c0_79 = arith.constant 0 : index
      %c0_80 = arith.constant 0 : index
      %c0_81 = arith.constant 0 : index
      %133 = vector.load %arg6[%c0_79, %c0_80, %c0_81] : memref<1x8x32xbf16, #tpu.memory_space<vmem>>, vector<1x8x32xbf16>
      %134 = vector.shape_cast %133 : vector<1x8x32xbf16> to vector<8x32xbf16>
      %135 = vector.shape_cast %132 : vector<8x32xbf16> to vector<1x8x32xbf16>
      tpu.vector_store %arg6[%c0_79, %c0_80, %c0_81], %135 {strides = array<i32>} : memref<1x8x32xbf16, #tpu.memory_space<vmem>>, vector<1x8x32xbf16>,
    } else {
    }
    return
  }
  func.func @transform_0(%arg0: i32, %arg1: i32, %arg2: i32) -> (i32, i32, i32, i32) {
    %c0_i32 = arith.constant 0 : i32
    %c0_i32_0 = arith.constant 0 : i32
    %c0_i32_1 = arith.constant 0 : i32
    return %c0_i32, %arg0, %arg1, %c0_i32_0 : i32, i32, i32, i32
  }
  func.func @transform_1(%arg0: i32, %arg1: i32, %arg2: i32) -> (i32, i32, i32, i32) {
    %c1_i32 = arith.constant 1 : i32
    %c0_i32 = arith.constant 0 : i32
    %c0_i32_0 = arith.constant 0 : i32
    return %c1_i32, %arg0, %arg2, %c0_i32 : i32, i32, i32, i32
  }
  func.func @transform_2(%arg0: i32, %arg1: i32, %arg2: i32) -> (i32, i32, i32, i32) {
    %c2_i32 = arith.constant 2 : i32
    %c0_i32 = arith.constant 0 : i32
    %c0_i32_0 = arith.constant 0 : i32
    return %c2_i32, %arg0, %arg2, %c0_i32 : i32, i32, i32, i32
  }
  func.func @transform_3(%arg0: i32, %arg1: i32, %arg2: i32) -> (i32, i32, i32) {
    %c0_i32 = arith.constant 0 : i32
    %c0_i32_0 = arith.constant 0 : i32
    return %arg0, %arg1, %c0_i32 : i32, i32, i32
  }
}

</mosaic_0001>

<bundles_post_ra>
// kernel: multi_head_attention.5
= control target key start
LH: loop header
LB: loop body
LE: loop exit
PB: predicated region body
PF: predicated region fallthrough
CT: control target
= control target key end

     0   :  { %s165_s0 = inlined_call_operand.vmem [shape: bf16[1,16,32], index: 0, kind: input, shape index: {}]   ;;  %s166_s1 = inlined_call_operand.vmem [shape: bf16[1,32,32], index: 1, kind: input, shape index: {}]   ;;  %s167_s2 = inlined_call_operand.vmem [shape: f32[1,1,32], index: 2, kind: input, shape index: {}]   ;;  %s168_s3 = inlined_call_operand.hbm [shape: f32[1,16,32], index: 3, kind: output, shape index: {}]  }
   0x1   :  { %v96_v0 = vld [vmem:[%s166_s1 + $0x8] sm:$0xff] }
   0x2   :  { %8 = vsyncpa [#allocation3], 0  ;;  %53 = vmatpush.bf16.msra.mxu0 %v96_v0  ;;  %v95_v1 = vld [vmem:[%s166_s1] sm:$0xff]  ;;  %vm43_vm0 = vcmask 261120   ;;  %s127_s20 = smov [#allocation2]   ;;  %s69_s1 = sshll.u32 %s168_s3, 4  ;;  %s70_s1 = int_to_ptr.hbm [resolvable:$true] %s69_s1 }
   0x3   :  { %v94_v2 = vld [vmem:[%s165_s0] sm:$0xff]  ;;  %s67_s21 = sshll.u32 %s127_s20, 4  ;;  %s128_s0 = smov 128   ;;  %s68_s21 = int_to_ptr.vmem [resolvable:$true] %s67_s21 }
   0x4   :  { %v100_v3 = vld [vmem:[%s167_s2] ss:$0 sm:$0xff]  ;;  %s129_s24 = smov 8  }
   0x6   :  { %54 = vmatpush.bf16.msra.mxu0 %v95_v1 }
   0x9   :  { %93 = vmatmul.msk.bf16.vlgmr.msra.gmra.mxu0 %vm43_vm0, %v94_v2 }
  0x86   :  { %v56_v4 = vpop.f32.mrf.mxu0 }
  0x87   :  { %v57_v5 = vadd.f32 %v100_v3, %v56_v4 }
  0x89   :  { %61 = vst.msk [vmem:[#allocation2] sm:$0xff] %vm43_vm0, %v57_v5 }
  0x8e   :  { %v58_v6 = vpop.f32.mrf.mxu0 }
  0x8f   :  { %v59_v7 = vadd.f32 %v100_v3, %v58_v6 }
  0x91   :  { %62 = vst.msk [vmem:[#allocation2 + $0x8] sm:$0xff] %vm43_vm0, %v59_v7 }
  0x92   :  { %75 = dma.vmem_to_hbm [thread:$0]  %s68_s21, 256, %s70_s1, [#allocation3], %s128_s0, %s128_s0, %s129_s24  }
  0x93   :  { %125 = dma.done.wait [#allocation3], 256  }
  0x94   :  { %126 = vsyncadd [#allocation3], 4294967040 }
  0x95   :  { %80 = vsyncpa [#allocation3], 1 }

// kernel: multi_head_attention.3
= control target key start
LH: loop header
LB: loop body
LE: loop exit
PB: predicated region body
PF: predicated region fallthrough
CT: control target
= control target key end

     0   :  { %s563_s12 = smov 0   ;;  %s565_s13 = smov 0   ;;  %s602_s0 = inlined_call_operand.vmem [shape: bf16[3,16,32], index: 0, kind: input, shape index: {}]   ;;  %s603_s1 = inlined_call_operand.vmem [shape: bf16[3,32,32], index: 1, kind: input, shape index: {}]   ;;  %s604_s2 = inlined_call_operand.vmem [shape: f32[3,1,32], index: 2, kind: input, shape index: {}]   ;;  %s605_s3 = inlined_call_operand.vmem [shape: bf16[3,16,32], index: 3, kind: output, shape index: {}]  }
   0x1   :  { %s567_s14 = smov 0  }
   0x2 LB: > { %s32_s15 = sadd.s32 1, %s537_s13  ;;  %p466_p0 = scmp.ge.s32.totalorder %s541_s14, 1  ;;  %s541_s14 = sphi %s567_s14, %s13_s14   ;;  %s537_s13 = sphi %s565_s13, %s607_s13   ;;  %s533_s12 = sphi %s563_s12, %s606_s12  }
   0x3   : > { %p34_p1 = scmp.ge.s32.totalorder %s32_s15, 3  ;;  %p195_p2 = scmp.lt.s32.totalorder %s541_s14, 4 }
   0x5   : > { %s609_s15 = smov (%p34_p1, %s32_s15), 0  ;;  %p196_p3 = pnand %p466_p0, %p195_p2 }
   0x6   : > { %p245_p4 = scmp.lt.s32.totalorder (!%p196_p3), %s533_s12, 2 }
   0x7   : > { %199 = sbr.rel (%p196_p3) target bundleno = 162 (0xa2), region = 32 }
   0xc   : > { %s611_s12 = smov (!%p245_p4, %s533_s12), 2  ;;  %vm309_vm0 = vcmask 261120   ;;  %vm329_vm1 = vcmask 257024  }
   0xd   : > { %s489_s16 = sshll.u32 %s611_s12, 4  ;;  %s488_s20 = sshll.u32 %s611_s12, 3 }
   0xe   : > { %s261_s19 = scalar_lea.vmem %s603_s1, %s489_s16  ;;  %s267_s23 = scalar_lea.vmem %s604_s2, %s611_s12 }
   0xf   : > { %v493_v0 = vld [vmem:[%s261_s19 + $0x8] sm:$0xff]  ;;  %v492_v1 = vld [vmem:[%s261_s19] sm:$0xff]  ;;  %s252_s26 = scalar_lea.vmem %s602_s0, %s488_s20  ;;  %s279_s29 = scalar_lea.vmem %s605_s3, %s488_s20 }
  0x10   : > { %319 = vmatpush.bf16.msra.mxu0 %v493_v0  ;;  %v491_v2 = vld [vmem:[%s252_s26] sm:$0xff] }
  0x11   : > { %v518_v3 = vld [vmem:[%s267_s23] ss:$0 sm:$0xff] }
  0x14   : > { %320 = vmatpush.bf16.msra.mxu0 %v492_v1 }
  0x17   : > { %485 = vmatmul.msk.bf16.vlgmr.msra.gmra.mxu0 %vm309_vm0, %v491_v2 }
  0x94   : > { %v322_v4 = vpop.f32.mrf.mxu0 }
  0x95   : > { %v323_v5 = vadd.f32 %v518_v3, %v322_v4 }
  0x97   : > { %v327_v6 = vpack.c.bf16 %v323_v5, %v323_v5 }
  0x99   : > { %330 = vst.msk [vmem:[%s279_s29] sm:$0xf] %vm329_vm1, %v327_v6 }
  0x9c   : > { %v324_v7 = vpop.f32.mrf.mxu0 }
  0x9d   : > { %v325_v8 = vadd.f32 %v518_v3, %v324_v7 }
  0x9f   : > { %v328_v9 = vpack.c.bf16 %v325_v8, %v325_v8 }
  0xa1   : > { %331 = vst.msk [vmem:[%s279_s29 + $0x4] sm:$0xf] %vm329_vm1, %v328_v9 }
  0xa2 PF: > { %s13_s14 = sadd.s32 1, %s541_s14   ;;  %s606_s12 = smov %s537_s13 }
  0xa3   : > { %p10_p5 = scmp.ge.s32.totalorder %s13_s14, 5   ;;  %s607_s13 = smov %s609_s15 }
  0xa5   :  { %12 = sbr.rel (!%p10_p5) target bundleno = 2 (0x2), region = 68 }

// kernel: multi_head_attention.4
= control target key start
LH: loop header
LB: loop body
LE: loop exit
PB: predicated region body
PF: predicated region fallthrough
CT: control target
= control target key end

     0   :  { %s955_s12 = smov 0   ;;  %s957_s13 = smov 0   ;;  %s1102_s0 = inlined_call_operand.vmem [shape: bf16[3,2,8,32], index: 0, kind: input, shape index: {}, may-alias: {0,1,2}]   ;;  %s1103_s1 = inlined_call_operand.vmem [shape: bf16[3,2,8,32], index: 1, kind: input, shape index: {}, may-alias: {0,1,2}]   ;;  %s1104_s2 = inlined_call_operand.vmem [shape: bf16[3,2,8,32], index: 2, kind: input, shape index: {}, may-alias: {0,1,2}]   ;;  %s1105_s3 = inlined_call_operand.vmem [shape: bf16[2,8,32], index: 3, kind: output, shape index: {}]  }
   0x1   :  { %s959_s14 = smov 0  }
   0x2 LB: > { %s32_s15 = sadd.s32 1, %s914_s13  ;;  %p806_p0 = scmp.ge.s32.totalorder %s918_s14, 1  ;;  %s918_s14 = sphi %s959_s14, %s13_s14   ;;  %s914_s13 = sphi %s957_s13, %s1107_s13   ;;  %s910_s12 = sphi %s955_s12, %s1106_s12  }
   0x3   : > { %p34_p1 = scmp.ge.s32.totalorder %s32_s15, 2  ;;  %p192_p2 = scmp.lt.s32.totalorder %s918_s14, 3 }
   0x5   : > { %s1109_s15 = smov (%p34_p1, %s32_s15), 0  ;;  %p193_p3 = pnand %p806_p0, %p192_p2 }
   0x6   : > { %p236_p4 = scmp.lt.s32.totalorder (!%p193_p3), %s910_s12, 1  ;;  %s920_s23 = smov (!%p193_p3), 120  }
   0x7   : > { %196 = sbr.rel (%p193_p3) target bundleno = 1288 (0x508), region = 32  ;;  %s922_s24 = smov (!%p193_p3), 112  }
   0x8   : > { %s924_s25 = smov (!%p193_p3), 104   ;;  %s929_s29 = smov (!%p193_p3), 1  }
   0x9   : > { %s930_s30 = smov (!%p193_p3), 8   ;;  %s931_s4 = smov (!%p193_p3), 2  }
   0xa   : > { %s932_s5 = smov (!%p193_p3), 24   ;;  %s933_s6 = smov (!%p193_p3), 3  }
   0xb   : > { %s934_s7 = smov (!%p193_p3), 16  }
   0xc   : > { %s1111_s12 = smov (!%p236_p4, %s910_s12), 1  ;;  %vm282_vm0 = vcmask 64512   ;;  %vm272_vm1 = vcmask 31744   ;;  %v921_v7 = vmov -inf   ;;  %v923_v14 = vmov 0  }
   0xd   : > { %s973_s16 = sshll.u32 %s1111_s12, 2  ;;  %273 = vst.msk [vmem:[#allocation2] sm:$0xff] %vm272_vm1, %v921_v7  ;;  %866 = vset.pattern.permute.xlu2 %v923_v14  ;;  %vm321_vm2 = vcmask 1043456   ;;  %v925_v24 = vmov 0.0   ;;  %v926_v27 = vmov 1   ;;  %v927_v56 = vmov 2  }
   0xe   : > { %s744_s19 = scalar_lea.vmem %s1103_s1, %s973_s16  ;;  %s242_s22 = scalar_lea.vmem %s1102_s0, %s973_s16  ;;  %v1009_v23 = vsel %vm321_vm2, 1065369472, %v923_v14  ;;  %274 = vst.msk [vmem:[#allocation3] sm:$0xff] %vm272_vm1, %v925_v24  ;;  %868 = vset.pattern.permute.xlu1 %v927_v56  ;;  %871 = vset.pattern.permute.xlu0 %v927_v56  ;;  %vm622_vm3 = vcmask 7168   ;;  %vm624_vm4 = vcmask 15360   ;;  %vm626_vm5 = vcmask 23552  }
   0xf   : > { %v811_v0 = vld [vmem:[%s744_s19 + $0x8] sm:$0xf]  ;;  %v279_v3 = vld [vmem:[%s242_s22] sm:$0xf]  ;;  %s748_s28 = scalar_lea.vmem %s1104_s2, %s973_s16  ;;  %348 = vmatpush.bf16.msra.mxu2 %v1009_v23  ;;  %vm275_vm6 = vcmask 261120   ;;  %vm635_vm7 = vcmask 130048   ;;  %s265_s10 = scalar_lea.vmem %s1105_s3, %s973_s16 }
  0x10   : > { %v287_v1 = vsel %vm282_vm0, %v811_v0, 0  ;;  %v367_v2 = vunpack.c.l.b16 %v811_v0  ;;  %v362_v5 = vunpack.c.l.b16 %v279_v3  ;;  %v812_v21 = vld [vmem:[%s748_s28 + $0x10] sm:$0xf]  ;;  %276 = vst.msk [vmem:[#allocation4] sm:$0xff] %vm275_vm6, %v925_v24  ;;  %vm637_vm8 = vcmask 195584  }
  0x11   : > { %296 = vmatpush.bf16.xpose.msra.mxu0 %v287_v1  ;;  %v323_v22 = vsel %vm321_vm2, %v812_v21, 0  ;;  %v407_v51 = vunpack.c.l.b16 %v812_v21  ;;  %vm687_vm9 = vcmask 257024  }
  0x12   : > { %v368_v4 = vpack.c.b16 %v367_v2, %v367_v2  ;;  %v363_v6 = vpack.c.b16 %v362_v5, %v362_v5  ;;  %332 = vmatpush.bf16.msra.mxu1 %v323_v22 }
  0x13   : > { %437 = vmatpush.bf16.msrb.mxu2 %v1009_v23  ;;  %v408_v53 = vpack.c.b16 %v407_v51, %v407_v51 }
  0x14   : > { %369 = vrot.lane.b32.xlu0 %v368_v4, %s920_s23  ;;  %v993_v15 = vld [vmem:[#allocation2] sm:$0xff] }
  0x18   : > { %813 = vmatmul.msk.bf16.vlgmr.msra.gmra.mxu0 %vm282_vm0, %v279_v3 }
  0x1c   : > { %364 = vrot.lane.b32.xlu0 %v363_v6, %s920_s23 }
  0x24   : > { %456 = vrot.lane.b32.xlu0 %v368_v4, %s922_s24 }
  0x2c   : > { %538 = vrot.lane.b32.xlu0 %v363_v6, %s924_s25 }
  0x86   : > { %v370_v8 = vpop.permute.xlu0 %369 }
  0x87   : > { %v375_v9 = vsel %vm282_vm0, %v370_v8, 0 }
  0x88   : > { %384 = vmatpush.bf16.xpose.msra.mxu3 %v375_v9 }
  0x8e   : > { %v365_v10 = vpop.permute.xlu0 %364 }
  0x8f   : > { %816 = vmatmul.msk.bf16.vlgmr.msra.gmra.mxu3 %vm282_vm0, %v365_v10 }
  0x95   : > { %v298_v11 = vpop.f32.mrf.mxu0 }
  0x96   : > { %v302_v12 = vsel %vm282_vm0, %v298_v11, -inf  ;;  %v457_v30 = vpop.permute.xlu0 %456 }
  0x97   : > { %303 = vmax.xlane.f32.xlu1 %v302_v12  ;;  %v462_v32 = vsel %vm282_vm0, %v457_v30, 0 }
  0x98   : > { %471 = vmatpush.bf16.xpose.msrb.mxu0 %v462_v32 }
  0x9d   : > { %v300_v13 = vpop.f32.mrf.mxu0 }
  0x9e   : > { %v539_v46 = vpop.permute.xlu0 %538 }
 0x10a   : > { %v304_v16 = vpop.xlane.xlu1 %303 }
 0x10b   : > { %v996_v17 = vmax.f32 %v993_v15, %v304_v16 }
 0x10d   : > { %311 = vperm.xlu2 %866, %v996_v17  }
 0x112   : > { %v386_v18 = vpop.f32.mrf.mxu3 }
 0x113   : > { %v390_v19 = vsel %vm282_vm0, %v386_v18, -inf }
 0x114   : > { %391 = vmax.xlane.f32.xlu1 %v390_v19 }
 0x115   : > { %867 = vset.pattern.permute.xlu2 %v926_v27 }
 0x11a   : > { %v388_v20 = vpop.f32.mrf.mxu3 }
 0x12d   : > { %454 = vrot.lane.b32.xlu1 %v363_v6, %s922_s24 }
 0x167   : > { %v312_v25 = vpop.permute.xlu2 %311 }
 0x168   : > { %v314_v26 = vsub.f32 %v298_v11, %v312_v25 }
 0x16a   : > { %v315_v28 = vmul.f32 1.442695, %v314_v26 }
 0x16c   : > { %878 = vpow2.f32 %v315_v28 }
 0x172   : > { %v879_v29 = vpop.eup %878 }
 0x173   : > { %v317_v31 = vpack.c.bf16 %v879_v29, %v879_v29 }
 0x175   : > { %814 = vmatmul.msk.bf16.vlgmr.msra.gmra.mxu1 %vm282_vm0, %v317_v31  ;;  %815 = vmatmul.msk.bf16.vlgmr.msra.gmra.mxu2 %vm282_vm0, %v317_v31 }
 0x187   : > { %v392_v33 = vpop.xlane.xlu1 %391 }
 0x188   : > { %v393_v34 = vmax.f32 %v993_v15, %v392_v33 }
 0x18a   : > { %399 = vperm.xlu2 %867, %v393_v34   ;;  %v394_v52 = vsub.f32 %v993_v15, %v393_v34  ;;  %v623_v0 = vsel %vm622_vm3, %v996_v17, %v393_v34 }
 0x18c   : > { %v395_v54 = vmul.f32 1.442695, %v394_v52 }
 0x192   : > { %540 = vrot.lane.b32.xlu2 %v368_v4, %s924_s25  ;;  %v928_v4 = vmov 3  }
 0x19f   : > { %v455_v35 = vpop.permute.xlu1 %454 }
 0x1a0   : > { %819 = vmatmul.msk.bf16.vlgmr.msrb.gmra.mxu0 %vm282_vm0, %v455_v35 }
 0x1e4   : > { %v400_v36 = vpop.permute.xlu2 %399 }
 0x1e5   : > { %v402_v37 = vsub.f32 %v386_v18, %v400_v36  ;;  %v306_v36 = vsub.f32 %v993_v15, %v996_v17 }
 0x1e7   : > { %v403_v38 = vmul.f32 1.442695, %v402_v37 }
 0x1e9   : > { %880 = vpow2.f32 %v403_v38  ;;  %v307_v38 = vmul.f32 1.442695, %v306_v36 }
 0x1ea   : > { %882 = vpow2.f32 %v395_v54 }
 0x1ec   : > { %v541_v39 = vpop.permute.xlu2 %540 }
 0x1ed   : > { %v546_v40 = vsel %vm282_vm0, %v541_v39, 0 }
 0x1ee   : > { %555 = vmatpush.bf16.xpose.msra.mxu2 %v546_v40 }
 0x1ef   : > { %v881_v41 = vpop.eup %880 }
 0x1f0   : > { %v1023_v42 = vpack.c.bf16 %v881_v41, %v881_v41  ;;  %v1035_v55 = vpop.eup %882 }
 0x1f2   : > { %v1025_v43 = vpop.f32.mrf.mxu1  ;;  %818 = vmatmul.msk.bf16.vlgmr.msrb.gmra.mxu2 %vm282_vm0, %v1023_v42 }
 0x1f8   : > { %v1029_v44 = vpop.f32.mrf.mxu2 }
 0x1fa   : > { %v336_v45 = vpop.f32.mrf.mxu1 }
 0x200   : > { %v352_v47 = vpop.f32.mrf.mxu2 }
 0x201   : > { %v278_v47 = vld [vmem:[#allocation3] sm:$0xff] }
 0x202   : > { %822 = vmatmul.msk.bf16.vlgmr.msra.gmra.mxu2 %vm282_vm0, %v539_v46 }
 0x21d   : > { %v473_v48 = vpop.f32.mrf.mxu0 }
 0x21e   : > { %v477_v49 = vsel %vm282_vm0, %v473_v48, -inf }
 0x21f   : > { %478 = vmax.xlane.f32.xlu2 %v477_v49 }
 0x225   : > { %v475_v50 = vpop.f32.mrf.mxu0 }
 0x237   : > { %577 = vrot.lane.b32.xlu2 %v408_v53, %s924_s25 }
 0x23f   : > { %451 = vperm.xlu2 %867, %v1035_v55  }
 0x247   : > { %875 = vset.pattern.permute.xlu2 %v927_v56 }
 0x275   : > { %v439_v57 = vpop.f32.mrf.mxu2 }
 0x27d   : > { %v441_v58 = vpop.f32.mrf.mxu2 }
 0x285   : > { %v557_v59 = vpop.f32.mrf.mxu2 }
 0x286   : > { %v561_v60 = vsel %vm282_vm0, %v557_v59, -inf }
 0x287   : > { %562 = vmax.xlane.f32.xlu0 %v561_v60 }
 0x28d   : > { %v559_v61 = vpop.f32.mrf.mxu2 }
 0x292   : > { %v479_v62 = vpop.xlane.xlu2 %478 }
 0x293   : > { %v480_v63 = vmax.f32 %v993_v15, %v479_v62 }
 0x295   : > { %v625_v1 = vsel %vm624_vm4, %v623_v0, %v480_v63  ;;  %486 = vperm.xlu1 %868, %v480_v63   ;;  %v481_v31 = vsub.f32 %v993_v15, %v480_v63 }
 0x297   : > { %v482_v32 = vmul.f32 1.442695, %v481_v31 }
 0x29a   : > { %v578_v2 = vpop.permute.xlu2 %577 }
 0x29b   : > { %v583_v3 = vsel %vm321_vm2, %v578_v2, 0  ;;  %v654_v2 = vld [vmem:[#allocation4] sm:$0xff] }
 0x29c   : > { %592 = vmatpush.bf16.msra.mxu0 %v583_v3 }
 0x29d   : > { %493 = vrot.lane.b32.xlu1 %v408_v53, %s922_s24 }
 0x29e   : > { %869 = vset.pattern.permute.xlu1 %v928_v4 }
 0x2a5   : > { %409 = vrot.lane.b32.xlu1 %v408_v53, %s920_s23 }
 0x2fa   : > { %v563_v5 = vpop.xlane.xlu0 %562 }
 0x2fb   : > { %v564_v6 = vmax.f32 %v993_v15, %v563_v5 }
 0x2fd   : > { %v627_v7 = vsel %vm626_vm5, %v625_v1, %v564_v6  ;;  %570 = vperm.xlu1 %869, %v564_v6   ;;  %v565_v41 = vsub.f32 %v993_v15, %v564_v6  ;;  %v443_v15 = vmul.f32 %v1035_v55, %v278_v47  ;;  %v452_v55 = vpop.permute.xlu2 %451 }
 0x2fe   : > { %629 = vst.msk [vmem:[#allocation2] sm:$0xff] %vm272_vm1, %v627_v7 }
 0x305   : > { %445 = vrot.lane.b32.xlu1 %v439_v57, %s929_s29 }
 0x306   : > { %870 = vset.pattern.permute.xlu1 %v923_v14 }
 0x307   : > { %v487_v8 = vpop.permute.xlu1 %486 }
 0x308   : > { %v489_v9 = vsub.f32 %v473_v48, %v487_v8 }
 0x30a   : > { %v490_v10 = vmul.f32 1.442695, %v489_v9 }
 0x30c   : > { %884 = vpow2.f32 %v490_v10 }
 0x30f   : > { %v494_v11 = vpop.permute.xlu1 %493 }
 0x310   : > { %v499_v12 = vsel %vm321_vm2, %v494_v11, 0 }
 0x311   : > { %508 = vmatpush.bf16.msrb.mxu3 %v499_v12 }
 0x312   : > { %v885_v13 = vpop.eup %884 }
 0x313   : > { %v492_v16 = vpack.c.bf16 %v885_v13, %v885_v13 }
 0x315   : > { %605 = vmatpush.bf16.msra.mxu3 %v1009_v23 }
 0x316   : > { %820 = vmatmul.msk.bf16.vlgmr.msrb.gmra.mxu3 %vm282_vm0, %v492_v16 }
 0x317   : > { %v410_v18 = vpop.permute.xlu1 %409 }
 0x318   : > { %v415_v19 = vsel %vm321_vm2, %v410_v18, 0 }
 0x319   : > { %424 = vmatpush.bf16.msrb.mxu1 %v415_v19 }
 0x31c   : > { %817 = vmatmul.msk.bf16.vlgmr.msrb.gmra.mxu1 %vm282_vm0, %v1023_v42  ;;  %v566_v42 = vmul.f32 1.442695, %v565_v41 }
 0x31d   : > { %521 = vmatpush.bf16.msra.mxu1 %v1009_v23 }
 0x32c   : > { %821 = vmatmul.msk.bf16.vlgmr.msra.gmra.mxu1 %vm282_vm0, %v492_v16 }
 0x36f   : > { %v571_v20 = vpop.permute.xlu1 %570 }
 0x370   : > { %v573_v21 = vsub.f32 %v557_v59, %v571_v20 }
 0x372   : > { %v574_v22 = vmul.f32 1.442695, %v573_v21 }
 0x374   : > { %886 = vpow2.f32 %v574_v22 }
 0x375   : > { %888 = vpow2.f32 %v482_v32 }
 0x376   : > { %890 = vpow2.f32 %v307_v38 }
 0x377   : > { %892 = vpow2.f32 %v566_v42  ;;  %v446_v17 = vpop.permute.xlu1 %445 }
 0x378   : > { %v448_v51 = vadd.f32 %v446_v17, %v443_v15 }
 0x37a   : > { %v887_v25 = vpop.eup %886 }
 0x37b   : > { %v576_v26 = vpack.c.bf16 %v887_v25, %v887_v25  ;;  %v889_v34 = vpop.eup %888 }
 0x37c   : > { %v891_v45 = vpop.eup %890  ;;  %v527_v49 = vmul.f32 %v889_v34, %v278_v47 }
 0x37d   : > { %823 = vmatmul.msk.bf16.vlgmr.msra.gmra.mxu0 %vm282_vm0, %v576_v26  ;;  %824 = vmatmul.msk.bf16.vlgmr.msra.gmra.mxu3 %vm282_vm0, %v576_v26  ;;  %v354_v50 = vmul.f32 %v891_v45, %v278_v47 }
 0x37f   : > { %v355_v53 = vadd.f32 %v354_v50, %v1029_v44 }
 0x381   : > { %v630_v57 = vsel %vm622_vm3, %v355_v53, %v448_v51 }
 0x399   : > { %v510_v28 = vpop.f32.mrf.mxu3  ;;  %v426_v29 = vpop.f32.mrf.mxu1 }
 0x39a   : > { %640 = vrot.lane.b32.xlu2 %v426_v29, %s930_s30 }
 0x3a1   : > { %v512_v23 = vpop.f32.mrf.mxu3  ;;  %v428_v30 = vpop.f32.mrf.mxu1 }
 0x3a9   : > { %v523_v33 = vpop.f32.mrf.mxu1 }
 0x3aa   : > { %529 = vrot.lane.b32.xlu0 %v523_v33, %s931_s4 }
 0x3b1   : > { %v525_v35 = vpop.f32.mrf.mxu1 }
 0x3b2   : > { %535 = vperm.xlu0 %871, %v889_v34  }
 0x3ba   : > { %873 = vset.pattern.permute.xlu0 %v923_v14  ;;  %v893_v14 = vpop.eup %892 }
 0x3bb   : > { %v611_v54 = vmul.f32 %v893_v14, %v278_v47 }
 0x3f4   : > { %v641_v63 = vpop.permute.xlu2 %640 }
 0x3f5   : > { %v651_v5 = vsel %vm282_vm0, %v1025_v43, %v641_v63 }
 0x3fa   : > { %v594_v37 = vpop.f32.mrf.mxu0 }
 0x3fb   : > { %648 = vrot.lane.b32.xlu2 %v594_v37, %s932_s5 }
 0x400   : > { %v607_v39 = vpop.f32.mrf.mxu3 }
 0x401   : > { %613 = vrot.lane.b32.xlu1 %v607_v39, %s933_s6 }
 0x402   : > { %v596_v40 = vpop.f32.mrf.mxu0 }
 0x408   : > { %v609_v46 = vpop.f32.mrf.mxu3 }
 0x409   : > { %358 = vperm.xlu1 %870, %v891_v45  }
 0x411   : > { %872 = vset.pattern.permute.xlu1 %v928_v4 }
 0x412   : > { %619 = vperm.xlu1 %872, %v893_v14  }
 0x41a   : > { %644 = vrot.lane.b32.xlu1 %v510_v28, %s934_s7 }
 0x41b   : > { %874 = vset.pattern.permute.xlu1 %v926_v27 }
 0x41c   : > { %v530_v48 = vpop.permute.xlu0 %529 }
 0x41d   : > { %v532_v52 = vadd.f32 %v530_v48, %v527_v49 }
 0x41f   : > { %v631_v58 = vsel %vm624_vm4, %v630_v57, %v532_v52 }
 0x424   : > { %v536_v0 = vpop.permute.xlu0 %535 }
 0x455   : > { %v649_v7 = vpop.permute.xlu2 %648 }
 0x473   : > { %v614_v56 = vpop.permute.xlu1 %613 }
 0x474   : > { %v616_v27 = vadd.f32 %v614_v56, %v611_v54 }
 0x476   : > { %v632_v24 = vsel %vm626_vm5, %v631_v58, %v616_v27 }
 0x477   : > { %633 = vst.msk [vmem:[#allocation3] sm:$0xff] %vm272_vm1, %v632_v24 }
 0x47b   : > { %v359_v59 = vpop.permute.xlu1 %358 }
 0x47c   : > { %v634_v44 = vsel %vm282_vm0, %v359_v59, %v452_v55 }
 0x47d   : > { %v636_v1 = vsel %vm635_vm7, %v634_v44, %v536_v0 }
 0x47e   : > { %v662_v60 = vld [vmem:[#allocation3] sm:$0xff] }
 0x47f   : > { %894 = vrcp.f32 %v662_v60 }
 0x484   : > { %v620_v61 = vpop.permute.xlu1 %619 }
 0x485   : > { %v895_v62 = vpop.eup %894  ;;  %v638_v3 = vsel %vm637_vm8, %v636_v1, %v620_v61 }
 0x486   : > { %670 = vperm.xlu1 %874, %v895_v62   ;;  %666 = vperm.xlu0 %873, %v895_v62   ;;  %v655_v8 = vmul.f32 %v654_v2, %v638_v3 }
 0x487   : > { %674 = vperm.xlu2 %875, %v895_v62  }
 0x48c   : > { %v645_v6 = vpop.permute.xlu1 %644 }
 0x48d   : > { %v652_v9 = vsel %vm635_vm7, %v651_v5, %v645_v6 }
 0x48e   : > { %v653_v10 = vsel %vm637_vm8, %v652_v9, %v649_v7  ;;  %876 = vset.pattern.permute.xlu1 %v928_v4  ;;  %877 = vset.pattern.permute.xlu0 %v928_v4 }
 0x48f   : > { %v656_v11 = vadd.f32 %v655_v8, %v653_v10  ;;  %678 = vperm.xlu1 %876, %v895_v62  }
 0x491   : > { %658 = vst.msk [vmem:[#allocation4] sm:$0xff] %vm275_vm6, %v656_v11 }
 0x498   : > { %v684_v21 = vld [vmem:[#allocation4] sm:$0xff] }
 0x4e1   : > { %v675_v16 = vpop.permute.xlu2 %674 }
 0x4f8   : > { %v671_v12 = vpop.permute.xlu1 %670  ;;  %v667_v13 = vpop.permute.xlu0 %666 }
 0x4f9   : > { %v681_v43 = vsel %vm282_vm0, %v667_v13, %v671_v12 }
 0x4fa   : > { %v682_v19 = vsel %vm635_vm7, %v681_v43, %v675_v16 }
 0x501   : > { %v679_v18 = vpop.permute.xlu1 %678 }
 0x502   : > { %v683_v20 = vsel %vm637_vm8, %v682_v19, %v679_v18 }
 0x503   : > { %v685_v22 = vmul.f32 %v684_v21, %v683_v20 }
 0x505   : > { %v686_v4 = vpack.c.bf16 %v685_v22, %v685_v22 }
 0x507   : > { %688 = vst.msk [vmem:[%s265_s10] sm:$0xf] %vm687_vm9, %v686_v4 }
 0x508 PF: > { %s13_s14 = sadd.s32 1, %s918_s14   ;;  %s1106_s12 = smov %s914_s13 }
 0x509   : > { %p10_p5 = scmp.ge.s32.totalorder %s13_s14, 4   ;;  %s1107_s13 = smov %s1109_s15 }
 0x50b   :  { %12 = sbr.rel (!%p10_p5) target bundleno = 2 (0x2), region = 76 }

</bundles_post_ra>
